<compile_context>
chip_gen: v7x
topology: tpu7x:2x2x1
jax: 0.10.0
libtpu: 0.0.40
codegen_flags: <defaults>
</compile_context>

<pallas_src>
import jax
import jax.numpy as jnp
from jax.experimental import pallas as pl
from jax.experimental.pallas import tpu as pltpu


_LANE = 128
_SUBLANE = 8

# VMEM budget for the batch-varying working set (double-buffered encoder tile
# + f32 intermediates + double-buffered output), counted with lane/sublane
# padding.  Kept well under the explicit vmem limit below and under v7x's
# 64 MiB physical VMEM.
_WORKING_SET_BUDGET = 24 << 20   # bytes
_VMEM_LIMIT_BYTES = 48 << 20     # > v5e 16 MiB scoped default, < v7x 64 MiB physical
_MAX_TILE_ROWS = 16 * 1024       # Bb*T ceiling (review: 4K-16K rows)
_TARGET_TILE_ROWS = 8 * 1024     # Bb*T target


def _round_up(x, m):
    return ((x + m - 1) // m) * m


def attention_kernel(enc_ref, s2_ref, w1_ref, v_ref, out_ref):
    # enc_ref : (Bb, T, H)  tile of encoder outputs (whole batch elements)
    # s2_ref  : (Bb, U)     precomputed condition projections for this tile
    # w1_ref  : (H, U)      resident
    # v_ref   : (1, U)      V as a row vector, resident
    # out_ref : (Bb, T)
    Bb, T, H = enc_ref.shape
    U = w1_ref.shape[1]

    # One big MXU matmul over all Bb*T rows of this tile.  T is padded to a
    # multiple of 8 in the wrapper, so this reshape is layout-preserving
    # (no hidden VMEM copy).
    enc2d = enc_ref[...].reshape(Bb * T, H)
    s1 = jnp.dot(enc2d, w1_ref[...], preferred_element_type=jnp.float32)  # (Bb*T, U)

    # Broadcast the per-batch-element condition projection over T; tanh on EUP.
    u = jnp.tanh(s1.reshape(Bb, T, U) + s2_ref[...][:, None, :])          # (Bb, T, U)

    # Final V projection: VPU multiply + XLU lane reduction, result already in
    # (Bb, T) output layout.
    scores = jnp.sum(u * v_ref[...][None, :, :], axis=-1)                 # (Bb, T)

    out_ref[...] = scores.astype(out_ref.dtype)


def _choose_block_batch(T_pad, H, U, enc_itemsize):
    """Pick Bb (multiple of 8) sized from the PADDED VMEM footprint."""
    h_lanes = _round_up(H, _LANE)
    u_lanes = _round_up(U, _LANE)
    t_lanes = _round_up(T_pad, _LANE)

    # Padded bytes per batch element:
    per_b_enc = T_pad * h_lanes * enc_itemsize        # encoder tile (per buffer)
    per_b_inter = T_pad * u_lanes * 4 * 2             # s1 + u intermediates (f32)
    per_b_out = t_lanes * 4                           # output tile (per buffer)
    per_b_total = 2 * per_b_enc + per_b_inter + 2 * per_b_out  # 2x: double buffering

    bb_vmem = max(_SUBLANE, (_WORKING_SET_BUDGET // per_b_total) // _SUBLANE * _SUBLANE)
    bb_rows_cap = max(_SUBLANE, (_MAX_TILE_ROWS // T_pad) // _SUBLANE * _SUBLANE)
    bb_target = max(_SUBLANE, (_TARGET_TILE_ROWS // T_pad) // _SUBLANE * _SUBLANE)
    return max(_SUBLANE, min(bb_vmem, bb_rows_cap, bb_target))


def attention_forward(encoder_out, condition_embedding, w1, w2, v):
    """encoder_out: (B, T, H), condition_embedding: (B, H),
       w1/w2: (H, U), v: (U, 1)  ->  (B, T) float32.

       encoder_out / w1 may be bfloat16 (recommended for large shapes); the
       MXU accumulates in f32 either way."""
    B, T, H = encoder_out.shape
    U = w1.shape[1]

    # ---- pad T so all in-kernel reshapes stay layout-preserving ------------
    T_pad = _round_up(T, _SUBLANE)
    if T_pad != T:
        encoder_out = jnp.pad(encoder_out, ((0, 0), (0, T_pad - T), (0, 0)))

    # ---- hoisted condition projection (one dense matmul) --------------------
    s2 = jnp.dot(condition_embedding, w2,
                 preferred_element_type=jnp.float32)                      # (B, U)
    v_row = v.reshape(1, U).astype(jnp.float32)                           # (1, U)

    # ---- VMEM-aware tile batch ----------------------------------------------
    enc_itemsize = jnp.dtype(encoder_out.dtype).itemsize
    Bb = _choose_block_batch(T_pad, H, U, enc_itemsize)

    if B <= _SUBLANE:
        # Tiny batch: a single 8-row tile is plenty.
        Bb = _SUBLANE
    elif 2 * Bb > B:
        # Guarantee >= 2 grid steps so v7x's two TensorCores both get work.
        Bb = max(_SUBLANE, _round_up(pl.cdiv(B, 2), _SUBLANE))

    # ---- pad B to a multiple of Bb (no whole-batch fallback for odd/prime B)
    B_pad = _round_up(max(B, Bb), Bb)
    if B_pad != B:
        encoder_out = jnp.pad(encoder_out, ((0, B_pad - B), (0, 0), (0, 0)))
        s2 = jnp.pad(s2, ((0, B_pad - B), (0, 0)))

    grid = (B_pad // Bb,)

    w1_itemsize = jnp.dtype(w1.dtype).itemsize
    cost = pl.CostEstimate(
        flops=2 * B_pad * T_pad * H * U + 2 * B_pad * T_pad * U,
        transcendentals=B_pad * T_pad * U,
        bytes_accessed=(B_pad * T_pad * H * enc_itemsize   # encoder_out stream
                        + B_pad * U * 4                    # s2
                        + H * U * w1_itemsize              # W1
                        + U * 4                            # V row
                        + B_pad * T_pad * 4),              # output
    )

    out = pl.pallas_call(
        attention_kernel,
        out_shape=jax.ShapeDtypeStruct((B_pad, T_pad), jnp.float32),
        grid_spec=pltpu.PrefetchScalarGridSpec(
            num_scalar_prefetch=0,
            grid=grid,
            in_specs=[
                pl.BlockSpec((Bb, T_pad, H), lambda i: (i, 0, 0)),  # encoder tile
                pl.BlockSpec((Bb, U), lambda i: (i, 0)),            # s2 tile
                pl.BlockSpec((H, U), lambda i: (0, 0)),             # W1 (resident)
                pl.BlockSpec((1, U), lambda i: (0, 0)),             # V row (resident)
            ],
            out_specs=pl.BlockSpec((Bb, T_pad), lambda i: (i, 0)),
        ),
        compiler_params=pltpu.CompilerParams(
            dimension_semantics=("parallel",),
            vmem_limit_bytes=_VMEM_LIMIT_BYTES,
        ),
        cost_estimate=cost,
    )(encoder_out, s2, w1, v_row)

    return out[:B, :T]


def attention_reference(encoder_out, condition_embedding, w1, w2, v):
    # Pure-JAX reference mirroring the PyTorch forward.
    s1 = encoder_out @ w1                              # (B, T, U)
    s2 = (condition_embedding @ w2)[:, None, :]        # (B, 1, U)
    u = jnp.tanh(s1 + s2)
    return (u @ v)[..., 0]                             # (B, T)


if __name__ == "__main__":
    B, T, H, U = 2, 8, 32, 32

    key = jax.random.PRNGKey(0)
    k_enc, k_cond, k_w1, k_w2, k_v = jax.random.split(key, 5)

    encoder_out = jax.random.normal(k_enc, (B, T, H), dtype=jnp.float32)
    condition_embedding = jax.random.normal(k_cond, (B, H), dtype=jnp.float32)

    # Deterministic parameter init, matching nn.Linear(bias=False) shapes
    # (kaiming-uniform-like bound 1/sqrt(fan_in)); stored transposed (in, out).
    bound_h = 1.0 / jnp.sqrt(H)
    bound_u = 1.0 / jnp.sqrt(U)
    w1 = jax.random.uniform(k_w1, (H, U), jnp.float32, -bound_h, bound_h)
    w2 = jax.random.uniform(k_w2, (H, U), jnp.float32, -bound_h, bound_h)
    v = jax.random.uniform(k_v, (U, 1), jnp.float32, -bound_u, bound_u)

    out = attention_forward(encoder_out, condition_embedding, w1, w2, v)
    out = jax.block_until_ready(out)

    ref = attention_reference(encoder_out, condition_embedding, w1, w2, v)
    assert out.shape == (B, T)
    assert jnp.allclose(out, ref, atol=1e-5, rtol=1e-5)

    print("KERNEL_OK")
</pallas_src>

<mosaic_0001>
module attributes {stable_mosaic.version = 11 : i64} {
  func.func @attention_kernel(%arg0: i32, %arg1: memref<8x8x32xf32, #tpu.memory_space<vmem>>, %arg2: memref<8x32xf32, #tpu.memory_space<vmem>>, %arg3: memref<32x32xf32, #tpu.memory_space<vmem>>, %arg4: memref<1x32xf32, #tpu.memory_space<vmem>>, %arg5: memref<8x8xf32, #tpu.memory_space<vmem>>) attributes {dimension_semantics = [#tpu.dimension_semantics<parallel>], iteration_bounds = array<i64: 1>, scalar_prefetch = 0 : i64, scratch_operands = 0 : i64, tpu.core_type = #tpu.core_type<tc>, window_params = [{transform_indices = @transform_0, window_bounds = array<i64: 8, 8, 32>}, {transform_indices = @transform_1, window_bounds = array<i64: 8, 32>}, {pipeline_mode = #tpu.pipeline_mode<synchronous>, transform_indices = @transform_2, window_bounds = array<i64: 32, 32>}, {pipeline_mode = #tpu.pipeline_mode<synchronous>, transform_indices = @transform_3, window_bounds = array<i64: 1, 32>}, {transform_indices = @transform_4, window_bounds = array<i64: 8, 8>}]} {
    %c0 = arith.constant 0 : index
    %c0_0 = arith.constant 0 : index
    %c0_1 = arith.constant 0 : index
    %0 = vector.load %arg1[%c0, %c0_0, %c0_1] : memref<8x8x32xf32, #tpu.memory_space<vmem>>, vector<8x8x32xf32>
    %1 = vector.shape_cast %0 : vector<8x8x32xf32> to vector<64x32xf32>
    %c0_2 = arith.constant 0 : index
    %c0_3 = arith.constant 0 : index
    %2 = vector.load %arg3[%c0_2, %c0_3] : memref<32x32xf32, #tpu.memory_space<vmem>>, vector<32x32xf32>
    %cst = arith.constant dense<0.000000e+00> : vector<64x32xf32>
    %3 = tpu.matmul %1, %2, %cst {dimension_numbers = #tpu.dot_dimension_numbers<[1], [0], [0], [1], [0, 0, 1, 1], [], []>} : vector<64x32xf32>, vector<32x32xf32>, vector<64x32xf32> -> vector<64x32xf32>
    %4 = vector.shape_cast %3 : vector<64x32xf32> to vector<8x8x32xf32>
    %c0_4 = arith.constant 0 : index
    %c0_5 = arith.constant 0 : index
    %5 = vector.load %arg2[%c0_4, %c0_5] : memref<8x32xf32, #tpu.memory_space<vmem>>, vector<8x32xf32>
    %6 = vector.shape_cast %5 : vector<8x32xf32> to vector<8x1x32xf32>
    %7 = vector.broadcast %6 : vector<8x1x32xf32> to vector<8x8x32xf32>
    %8 = arith.addf %4, %7 : vector<8x8x32xf32>
    %9 = math.tanh %8 : vector<8x8x32xf32>
    %c0_6 = arith.constant 0 : index
    %c0_7 = arith.constant 0 : index
    %10 = vector.load %arg4[%c0_6, %c0_7] : memref<1x32xf32, #tpu.memory_space<vmem>>, vector<1x32xf32>
    %11 = vector.shape_cast %10 : vector<1x32xf32> to vector<1x1x32xf32>
    %12 = vector.broadcast %11 : vector<1x1x32xf32> to vector<8x8x32xf32>
    %13 = arith.mulf %9, %12 : vector<8x8x32xf32>
    %cst_8 = arith.constant dense<0.000000e+00> : vector<8x8xf32>
    %14 = vector.multi_reduction <add>, %13, %cst_8 [2] : vector<8x8x32xf32> to vector<8x8xf32>
    %c0_9 = arith.constant 0 : index
    %c0_10 = arith.constant 0 : index
    %15 = vector.load %arg5[%c0_9, %c0_10] : memref<8x8xf32, #tpu.memory_space<vmem>>, vector<8x8xf32>
    tpu.vector_store %arg5[%c0_9, %c0_10], %14 {strides = array<i32>} : memref<8x8xf32, #tpu.memory_space<vmem>>, vector<8x8xf32>,
    return
  }
  func.func @transform_0(%arg0: i32) -> (i32, i32, i32) {
    %c0_i32 = arith.constant 0 : i32
    %c0_i32_0 = arith.constant 0 : i32
    %c0_i32_1 = arith.constant 0 : i32
    return %arg0, %c0_i32, %c0_i32_0 : i32, i32, i32
  }
  func.func @transform_1(%arg0: i32) -> (i32, i32) {
    %c0_i32 = arith.constant 0 : i32
    %c0_i32_0 = arith.constant 0 : i32
    return %arg0, %c0_i32 : i32, i32
  }
  func.func @transform_2(%arg0: i32) -> (i32, i32) {
    %c0_i32 = arith.constant 0 : i32
    %c0_i32_0 = arith.constant 0 : i32
    %c0_i32_1 = arith.constant 0 : i32
    return %c0_i32, %c0_i32_0 : i32, i32
  }
  func.func @transform_3(%arg0: i32) -> (i32, i32) {
    %c0_i32 = arith.constant 0 : i32
    %c0_i32_0 = arith.constant 0 : i32
    %c0_i32_1 = arith.constant 0 : i32
    return %c0_i32, %c0_i32_0 : i32, i32
  }
  func.func @transform_4(%arg0: i32) -> (i32, i32) {
    %c0_i32 = arith.constant 0 : i32
    %c0_i32_0 = arith.constant 0 : i32
    return %arg0, %c0_i32 : i32, i32
  }
}

</mosaic_0001>

<bundles_post_ra>
// kernel: tpu_custom_call.1
= control target key start
LH: loop header
LB: loop body
LE: loop exit
PB: predicated region body
PF: predicated region fallthrough
CT: control target
= control target key end

     0   :  { %9 = vsyncpa [#allocation3], 0  ;;  %s707_s0 = inlined_call_operand.hbm [shape: f32[8,8,32], index: 0, kind: input, shape index: {}]   ;;  %s708_s1 = inlined_call_operand.hbm [shape: f32[8,32], index: 1, kind: input, shape index: {}]   ;;  %s709_s2 = inlined_call_operand.hbm [shape: f32[32,32], index: 2, kind: input, shape index: {}]   ;;  %s710_s3 = inlined_call_operand.vmem [shape: f32[1,32], index: 3, kind: input, shape index: {}]   ;;  %s711_s4 = inlined_call_operand.hbm [shape: f32[8,8], index: 4, kind: output, shape index: {}]  }
   0x1   :  { %10 = vsyncpa [#allocation6], 0 }
   0x2   :  { %11 = vsyncpa [#allocation4], 0  ;;  %s591_s15 = smov [#allocation5]   ;;  %s592_s17 = smov [#allocation2]  }
   0x3   :  { %s30_s16 = sshll.u32 %s591_s15, 4  ;;  %s17_s18 = sshll.u32 %s592_s17, 4  ;;  %s31_s16 = int_to_ptr.vmem [resolvable:$true] %s30_s16  ;;  %s623_s18 = int_to_ptr.vmem [resolvable:$true] %s17_s18 }
   0x4   :  { %s497_s21 = scalar_lea.hbm %s708_s1, 128 }
   0x5   :  { %p498_p0 = scmp.ne.s32.totalorder %s708_s1, %s497_s21  ;;  %p501_p1 = scmp.lt.u32.totalorder %s497_s21, %s708_s1 }
   0x7   :  { %p503_p2 = pnand %p501_p1, %p498_p0 }
   0x9   :  { %506 = shalt.err (!%p503_p2)
}
   0xa   :  { %s507_s26 = scalar_lea.vmem %s31_s16, 128  ;;  %p512_p4 = scmp.lt.s32.totalorder %s31_s16, %s31_s16 }
   0xb   :  { %p508_p3 = scmp.ne.s32.totalorder %s31_s16, %s507_s26  ;;  %p513_p5 = scmp.lt.s32.totalorder %s507_s26, %s507_s26 }
   0xd   :  { %p514_p6 = por %p513_p5, %p512_p4 }
   0xf   :  { %p515_p7 = pnand %p514_p6, %p508_p3 }
  0x11   :  { %518 = shalt.err (!%p515_p7)
}
  0x12   :  { %33 = dma.hbm_to_vmem [thread:$0]  %s708_s1, 128, %s31_s16, [#allocation6]  }
  0x13   :  { %s519_s5 = scalar_lea.hbm %s707_s0, 1024 }
  0x14   :  { %p520_p8 = scmp.ne.s32.totalorder %s707_s0, %s519_s5  ;;  %p523_p9 = scmp.lt.u32.totalorder %s519_s5, %s707_s0 }
  0x16   :  { %p525_p10 = pnand %p523_p9, %p520_p8 }
  0x18   :  { %528 = shalt.err (!%p525_p10)
}
  0x19   :  { %s529_s10 = scalar_lea.vmem %s623_s18, 1024  ;;  %p534_p12 = scmp.lt.s32.totalorder %s623_s18, %s623_s18 }
  0x1a   :  { %p530_p11 = scmp.ne.s32.totalorder %s623_s18, %s529_s10  ;;  %p535_p13 = scmp.lt.s32.totalorder %s529_s10, %s529_s10 }
  0x1c   :  { %p536_p0 = por %p535_p13, %p534_p12 }
  0x1e   :  { %p537_p1 = pnand %p536_p0, %p530_p11 }
  0x20   :  { %540 = shalt.err (!%p537_p1)
}
  0x21   :  { %s593_s1 = smov 128   ;;  %s594_s11 = smov 8  }
  0x22   :  { %23 = dma.hbm_to_vmem [thread:$0]  %s707_s0, 1024, %s623_s18, [#allocation3], %s593_s1, %s593_s1, %s594_s11  }
  0x23   :  { %s595_s14 = smov [#allocation7]   ;;  %s541_s19 = scalar_lea.hbm %s709_s2, 512 }
  0x24   :  { %s39_s15 = sshll.u32 %s595_s14, 4  ;;  %p542_p2 = scmp.ne.s32.totalorder %s709_s2, %s541_s19  ;;  %s40_s15 = int_to_ptr.vmem [resolvable:$true] %s39_s15 }
  0x25   :  { %p545_p3 = scmp.lt.u32.totalorder %s541_s19, %s709_s2 }
  0x27   :  { %p547_p4 = pnand %p545_p3, %p542_p2 }
  0x29   :  { %550 = shalt.err (!%p547_p4)
}
  0x2a   :  { %s551_s24 = scalar_lea.vmem %s40_s15, 512  ;;  %p556_p6 = scmp.lt.s32.totalorder %s40_s15, %s40_s15 }
  0x2b   :  { %p552_p5 = scmp.ne.s32.totalorder %s40_s15, %s551_s24  ;;  %p557_p7 = scmp.lt.s32.totalorder %s551_s24, %s551_s24 }
  0x2d   :  { %p558_p8 = por %p557_p7, %p556_p6 }
  0x2f   :  { %p559_p9 = pnand %p558_p8, %p552_p5 }
  0x31   :  { %562 = shalt.err (!%p559_p9)
}
  0x32   :  { %45 = dma.hbm_to_vmem [thread:$0]  %s709_s2, 512, %s40_s15, [#allocation6], %s593_s1, %s593_s1, %s594_s11  }
  0x33   :  { %585 = dma.done.wait [#allocation3], 1024  }
  0x34   :  { %586 = vsyncadd [#allocation3], 4294966272 }
  0x35   :  { %587 = dma.done.wait [#allocation6], 640  }
  0x36   :  { %588 = vsyncadd [#allocation6], 4294966656  ;;  %vm69_vm0 = vcmask 261120   ;;  %v65_v0 = vld [vmem:[#allocation7] sm:$0xff]  ;;  %v66_v1 = vld [vmem:[#allocation7 + $0x8] sm:$0xff]  ;;  %v205_v14 = vlaneseq  ;;  %vm387_vm1 = vcmask 1041409  }
  0x37   :  { %v67_v2 = vld [vmem:[#allocation7 + $0x10] sm:$0xff]  ;;  %v461_v3 = vpack.c.bf16 %v66_v1, %v65_v0  ;;  %v68_v4 = vld [vmem:[#allocation7 + $0x18] sm:$0xff]  ;;  %v58_v8 = vld [vmem:[#allocation2 + $0x8] sm:$0xff]  ;;  %v596_v18 = vmov 1966171168   ;;  %vm389_vm2 = vcmask 1042434  }
  0x38   :  { %v57_v5 = vld [vmem:[#allocation2] sm:$0xff]  ;;  %v465_v6 = vpack.c.bf16 %v68_v4, %v67_v2  ;;  %v62_v9 = vld [vmem:[#allocation2 + $0x28] sm:$0xff]  ;;  %v59_v10 = vld [vmem:[#allocation2 + $0x10] sm:$0xff]  ;;  %v206_v15 = vshrl.u32 %v205_v14, 7  ;;  %v354_v16 = vand.u32 127, %v205_v14  ;;  %v203_v19 = vunpack.c.l.s4 %v596_v18 }
  0x39   :  { %449 = vmatprep.mubr.msk.f32.mxu0 %vm69_vm0, %v57_v5  ;;  %462 = vmatprep.subr.bf16.mxu0 %v461_v3  ;;  %v61_v7 = vld [vmem:[#allocation2 + $0x20] sm:$0xff]  ;;  %v63_v11 = vld [vmem:[#allocation2 + $0x30] sm:$0xff]  ;;  %v60_v12 = vld [vmem:[#allocation2 + $0x18] sm:$0xff]  ;;  %vm391_vm3 = vcmask 1043459   ;;  %vm393_vm4 = vcmask 1044484   ;;  %vm395_vm5 = vcmask 1045509  }
  0x3a   :  { %469 = vmatprep.subr.bf16.mxu1 %v461_v3  ;;  %464 = vmatpush3.bf16.msra.mxu0 %v461_v3  ;;  %v64_v13 = vld [vmem:[#allocation2 + $0x38] sm:$0xff]  ;;  %v674_v17 = vsub.s32 %v354_v16, %v206_v15  ;;  %v204_v20 = vunpack.c.0.s8 %v203_v19  ;;  %v199_v22 = vld [vmem:[#allocation5] sm:$0xff]  ;;  %v252_v28 = vsub.s32 0, %v206_v15  ;;  %vm397_vm6 = vcmask 1046534  }
  0x3b   :  { %471 = vmatpush3.bf16.msra.mxu1 %v461_v3  ;;  %466 = vmatprep.subr.bf16.mxu0 %v465_v6  ;;  %v201_v24 = vcombine.high %v199_v22, %v199_v22  ;;  %v428_v61 = vld [vmem:[%s710_s3] ss:$0 sm:$0xff]  ;;  %s597_s3 = smov [#allocation8]   ;;  %vm399_vm7 = vcmask 1047559   ;;  %vm402_vm8 = vcmask 64512  }
  0x3c   :  { %470 = vmatprep.subr.bf16.mxu1 %v465_v6  ;;  %455 = vmatprep.mubr.msk.f32.mxu1 %vm69_vm0, %v61_v7  ;;  %v207_v21 = vsub.s32 %v204_v20, %v206_v15  ;;  %s410_s26 = sshll.u32 %s597_s3, 4  ;;  %s411_s26 = int_to_ptr.vmem [resolvable:$true] %s410_s26 }
  0x3d   :  { %s563_s27 = scalar_lea.vmem %s411_s26, 128  ;;  %p568_p11 = scmp.lt.s32.totalorder %s411_s26, %s411_s26 }
  0x3e   :  { %468 = vmatpush3.bf16.msra.mxu0 %v465_v6  ;;  %v208_v23 = vrot.slane %v199_v22, %v207_v21  ;;  %v215_v26 = vrot.slane %v201_v24, %v207_v21  ;;  %p564_p10 = scmp.ne.s32.totalorder %s411_s26, %s563_s27  ;;  %p569_p12 = scmp.lt.s32.totalorder %s563_s27, %s563_s27 }
  0x3f   :  { %472 = vmatpush3.bf16.msra.mxu1 %v465_v6 }
  0x40   :  { %v216_v25 = vcombine.high %v208_v23, %v208_v23  ;;  %v224_v29 = vrot.slane %v208_v23, %v207_v21  ;;  %v231_v30 = vrot.slane %v215_v26, %v207_v21  ;;  %v217_v31 = vcombine.high %v215_v26, %v215_v26  ;;  %p570_p13 = por %p569_p12, %p568_p11 }
  0x41   :  { %450 = vmatmul.mubr.msk.f32.vlgmr.msra.gmra.mrb[0].mxu0 %vm69_vm0, %v58_v8 }
  0x42   :  { %456 = vmatmul.mubr.msk.f32.vlgmr.msra.gmra.mrb[0].mxu1 %vm69_vm0, %v62_v9  ;;  %452 = vmatprep.mubr.msk.f32.mxu0 %vm69_vm0, %v59_v10  ;;  %v238_v27 = vrot.slane %v216_v25, %v207_v21  ;;  %v253_v34 = vrot.slane %v224_v29, %v252_v28  ;;  %v246_v35 = vcombine.high %v224_v29, %v224_v29  ;;  %p571_p0 = pnand %p570_p13, %p564_p10 }
  0x43   :  { %458 = vmatprep.mubr.msk.f32.mxu1 %vm69_vm0, %v63_v11  ;;  %v269_v36 = vrot.slane %v231_v30, %v252_v28  ;;  %v247_v37 = vcombine.high %v231_v30, %v231_v30  ;;  %v245_v38 = vrot.slane %v217_v31, %v207_v21 }
  0x44   :  { %v257_v32 = vrot.slane %v238_v27, %v252_v28  ;;  %v248_v33 = vcombine.high %v238_v27, %v238_v27  ;;  %v261_v46 = vrot.slane %v246_v35, %v252_v28 }
  0x45   :  { %453 = vmatmul.mubr.msk.f32.gmra.mrb[2].mxu0 %vm69_vm0, %v60_v12  ;;  %v277_v48 = vrot.slane %v247_v37, %v252_v28  ;;  %v273_v49 = vrot.slane %v245_v38, %v252_v28  ;;  %v249_v50 = vcombine.high %v245_v38, %v245_v38 }
  0x46   :  { %459 = vmatmul.mubr.msk.f32.gmra.mrb[2].mxu1 %vm69_vm0, %v64_v13  ;;  %v265_v43 = vrot.slane %v248_v33, %v252_v28 }
  0x47   :  { %v281_v59 = vrot.slane %v249_v50, %v252_v28 }
 0x114   :  { %v451_v39 = vpop.f32.mrb[0].mxu0 }
 0x115   :  { %v457_v40 = vpop.f32.mrb[0].mxu1  ;;  %v291_v41 = vadd.f32 %v451_v39, %v257_v32  ;;  %v160_v42 = vpop.f32.mrb[1].mxu0 }
 0x116   :  { %v180_v44 = vpop.f32.mrb[1].mxu1  ;;  %v290_v45 = vadd.f32 %v253_v34, %v160_v42  ;;  %v295_v58 = vadd.f32 %v457_v40, %v273_v49 }
 0x117   :  { %v294_v47 = vadd.f32 %v269_v36, %v180_v44  ;;  %481 = vtanh.f32 %v291_v41 }
 0x118   :  { %483 = vtanh.f32 %v290_v45  ;;  %v454_v51 = vpop.f32.mrb[2].mxu0 }
 0x119   :  { %v460_v52 = vpop.f32.mrb[2].mxu1  ;;  %v293_v53 = vadd.f32 %v454_v51, %v265_v43  ;;  %v170_v54 = vpop.f32.mrb[3].mxu0  ;;  %485 = vtanh.f32 %v294_v47 }
 0x11a   :  { %v190_v55 = vpop.f32.mrb[3].mxu1  ;;  %v292_v56 = vadd.f32 %v261_v46, %v170_v54  ;;  %v297_v60 = vadd.f32 %v460_v52, %v281_v59 }
 0x11b   :  { %v296_v57 = vadd.f32 %v277_v48, %v190_v55  ;;  %487 = vtanh.f32 %v293_v53 }
 0x11c   :  { %489 = vtanh.f32 %v292_v56 }
 0x11d   :  { %491 = vtanh.f32 %v296_v57 }
 0x11e   :  { %493 = vtanh.f32 %v295_v58 }
 0x11f   :  { %495 = vtanh.f32 %v297_v60 }
 0x121   :  { %v482_v62 = vpop.eup %481 }
 0x122   :  { %v484_v63 = vpop.eup %483  ;;  %v314_v0 = vmul.f32 %v482_v62, %v428_v61 }
 0x123   :  { %v486_v1 = vpop.eup %485  ;;  %v313_v3 = vmul.f32 %v484_v63, %v428_v61 }
 0x124   :  { %v324_v2 = vsel %vm69_vm0, %v314_v0, 0.0  ;;  %v317_v7 = vmul.f32 %v486_v1, %v428_v61 }
 0x125   :  { %v488_v4 = vpop.eup %487  ;;  %325 = vadd.xlane.f32.xlu0 %v324_v2  ;;  %v321_v9 = vsel %vm69_vm0, %v313_v3, 0.0 }
 0x126   :  { %v490_v5 = vpop.eup %489  ;;  %v316_v6 = vmul.f32 %v488_v4, %v428_v61  ;;  %v333_v13 = vsel %vm69_vm0, %v317_v7, 0.0 }
 0x127   :  { %v492_v8 = vpop.eup %491  ;;  %v315_v11 = vmul.f32 %v490_v5, %v428_v61 }
 0x128   :  { %v330_v10 = vsel %vm69_vm0, %v316_v6, 0.0  ;;  %v494_v12 = vpop.eup %493  ;;  %v319_v14 = vmul.f32 %v492_v8, %v428_v61 }
 0x129   :  { %322 = vadd.xlane.f32.xlu0 %v321_v9  ;;  %331 = vadd.xlane.f32.xlu1 %v330_v10  ;;  %v327_v15 = vsel %vm69_vm0, %v315_v11, 0.0  ;;  %v318_v16 = vmul.f32 %v494_v12, %v428_v61  ;;  %v496_v18 = vpop.eup %495 }
 0x12a   :  { %v339_v19 = vsel %vm69_vm0, %v319_v14, 0.0  ;;  %v320_v21 = vmul.f32 %v496_v18, %v428_v61 }
 0x12b   :  { %v336_v20 = vsel %vm69_vm0, %v318_v16, 0.0 }
 0x12c   :  { %v342_v22 = vsel %vm69_vm0, %v320_v21, 0.0 }
 0x12d   :  { %328 = vadd.xlane.f32.xlu1 %v327_v15  ;;  %334 = vadd.xlane.f32.xlu0 %v333_v13 }
 0x131   :  { %337 = vadd.xlane.f32.xlu1 %v336_v20  ;;  %340 = vadd.xlane.f32.xlu0 %v339_v19 }
 0x135   :  { %343 = vadd.xlane.f32.xlu1 %v342_v22 }
 0x1b2   :  { %v326_v23 = vpop.xlane.xlu0 %325 }
 0x1b3   :  { %v362_v27 = vrot.slane %v326_v23, %v674_v17 }
 0x1b6   :  { %v323_v24 = vpop.xlane.xlu0 %322  ;;  %v332_v25 = vpop.xlane.xlu1 %331 }
 0x1b7   :  { %v358_v26 = vrot.slane %v323_v24, %v674_v17  ;;  %v370_v33 = vrot.slane %v332_v25, %v674_v17 }
 0x1b9   :  { %v388_v32 = vsel %vm387_vm1, %v362_v27, %v358_v26 }
 0x1ba   :  { %v329_v28 = vpop.xlane.xlu1 %328  ;;  %v335_v29 = vpop.xlane.xlu0 %334 }
 0x1bb   :  { %v366_v30 = vrot.slane %v329_v28, %v674_v17  ;;  %v374_v31 = vrot.slane %v335_v29, %v674_v17 }
 0x1bd   :  { %v390_v34 = vsel %vm389_vm2, %v366_v30, %v388_v32 }
 0x1be   :  { %v392_v35 = vsel %vm391_vm3, %v370_v33, %v390_v34  ;;  %v338_v36 = vpop.xlane.xlu1 %337  ;;  %v341_v37 = vpop.xlane.xlu0 %340 }
 0x1bf   :  { %v394_v38 = vsel %vm393_vm4, %v374_v31, %v392_v35  ;;  %v378_v39 = vrot.slane %v338_v36, %v674_v17  ;;  %v382_v40 = vrot.slane %v341_v37, %v674_v17 }
 0x1c1   :  { %v396_v41 = vsel %vm395_vm5, %v378_v39, %v394_v38 }
 0x1c2   :  { %v344_v42 = vpop.xlane.xlu1 %343  ;;  %v398_v44 = vsel %vm397_vm6, %v382_v40, %v396_v41 }
 0x1c3   :  { %v386_v43 = vrot.slane %v344_v42, %v674_v17 }
 0x1c5   :  { %v400_v45 = vsel %vm399_vm7, %v386_v43, %v398_v44 }
 0x1c6   :  { %403 = vst.msk [vmem:[#allocation8] sm:$0xff] %vm402_vm8, %v400_v45 }
 0x1c7   :  { %574 = shalt.err (!%p571_p0)
}
 0x1c8   :  { %s575_s30 = scalar_lea.hbm %s711_s4, 128 }
 0x1c9   :  { %p576_p1 = scmp.ne.s32.totalorder %s711_s4, %s575_s30  ;;  %p579_p2 = scmp.lt.u32.totalorder %s575_s30, %s711_s4 }
 0x1cb   :  { %p581_p3 = pnand %p579_p2, %p576_p1 }
 0x1cd   :  { %584 = shalt.err (!%p581_p3)
}
 0x1ce   :  { %413 = dma.vmem_to_hbm [thread:$0]  %s411_s26, 128, %s711_s4, [#allocation4]  }
 0x1cf   :  { %589 = dma.done.wait [#allocation4], 128  }
 0x1d0   :  { %590 = vsyncadd [#allocation4], 4294967168 }
 0x1d1   :  { %417 = vsyncpa [#allocation3], 1 }
 0x1d2   :  { %418 = vsyncpa [#allocation6], 1 }
 0x1d3   :  { %419 = vsyncpa [#allocation4], 1 }

</bundles_post_ra>
